<compile_context>
chip_gen: v6e
topology: v6e:2x2x1
jax: 0.10.0
libtpu: 0.0.40
codegen_flags: <defaults>
</compile_context>

<pallas_src>
import math

import jax
import jax.numpy as jnp
from jax import lax
from jax.experimental import pallas as pl
from jax.experimental.pallas import tpu as pltpu


def _filter_kernel(x_ref, w_ref, b_ref, o_ref):
    """One grid step = one lane-packed node tile of a single plane.

    x_ref: (tile_m, g*D) VMEM  -- g nodes packed per 128-lane row
    w_ref: (g*D, g)      VMEM  -- block-diagonal weight, W[i*D + j, i] = w[j]
    b_ref: (1, 1)   f32  SMEM  -- plane bias
    o_ref: (tile_m, g) f32 VMEM -- sigmoid scores; row-major order == node order
    """
    logits = jnp.dot(x_ref[...], w_ref[...],
                     preferred_element_type=jnp.float32)
    logits = logits + b_ref[0, 0]
    # numerically stable sigmoid: exp argument is always <= 0 (EUP exp + VPU)
    pos = logits >= 0.0
    z = jnp.exp(jnp.where(pos, -logits, logits))
    inv = 1.0 / (1.0 + z)
    o_ref[...] = jnp.where(pos, inv, z * inv).astype(o_ref.dtype)


def filter_plane_forward(x_flat, w, b, *, tile_nodes: int = 16384):
    """sigmoid(x_flat @ w.T + b)[:, 0] for one plane via a Pallas TPU kernel.

    x_flat: [N, D] f32/bf16 -- flattened node features
    w     : [1, D] f32      -- Linear(D, 1) weight
    b     : [1]    f32      -- Linear(D, 1) bias
    returns [N] f32
    """
    n, d = x_flat.shape
    if x_flat.dtype not in (jnp.float32, jnp.bfloat16):
        x_flat = x_flat.astype(jnp.float32)
    w_vec = w.reshape(d).astype(jnp.float32)
    b_smem = b.reshape(1, 1).astype(jnp.float32)

    # Pack g = 128 // D nodes per 128-lane row so the x tile fully occupies
    # the lane dimension (falls back to g = 1 if D does not divide 128).
    group = 128 // d if (d <= 128 and 128 % d == 0) else 1
    lanes = group * d
    rem = n % group
    n_main = n - rem

    outs = []
    if n_main > 0:
        m_rows = n_main // group
        if rem:
            # NOTE: keep N % group == 0 upstream to make this a pure bitcast;
            # with a remainder XLA materializes the sliced copy.
            x_packed = x_flat[:n_main].reshape(m_rows, lanes)
        else:
            x_packed = x_flat.reshape(m_rows, lanes)   # bitcast, no HBM traffic

        # Block-diagonal weight (g*D, g): W[i*D + j, i] = w[j].  The extra
        # zero-lane MACs are free on a memory-bound kernel.
        w_pack = jnp.kron(jnp.eye(group, dtype=jnp.float32),
                          w_vec.reshape(d, 1)).astype(x_packed.dtype)

        # ~tile_nodes nodes per grid step (>= 1 MiB of real payload).
        tile_m = max(tile_nodes // group, 8)
        if m_rows <= tile_m:
            tile_m = m_rows                     # single block == full array
        else:
            tile_m = max((tile_m // 8) * 8, 8)  # keep sublane dim a multiple of 8
        num_tiles = pl.cdiv(m_rows, tile_m)     # last block may be partial:
                                                # OOB rows dropped on writeback

        out_main = pl.pallas_call(
            _filter_kernel,
            out_shape=jax.ShapeDtypeStruct((m_rows, group), jnp.float32),
            grid=(num_tiles,),
            in_specs=[
                pl.BlockSpec((tile_m, lanes), lambda i: (i, 0)),
                pl.BlockSpec((lanes, group), lambda i: (0, 0)),
                pl.BlockSpec(memory_space=pltpu.MemorySpace.SMEM),
            ],
            out_specs=pl.BlockSpec((tile_m, group), lambda i: (i, 0)),
            compiler_params=pltpu.CompilerParams(
                dimension_semantics=("parallel",)),   # v7x: shard tiles over 2 TCs
        )(x_packed, w_pack, b_smem)
        outs.append(out_main.reshape(n_main))          # bitcast back to node order

    if rem:
        # < group leftover nodes: negligible, plain JAX.
        tail = x_flat[n_main:].astype(jnp.float32)
        outs.append(jax.nn.sigmoid(tail @ w_vec + b_smem[0, 0]))

    return outs[0] if len(outs) == 1 else jnp.concatenate(outs, axis=0)


class FilterDecoderPallas:
    """JAX/Pallas port of the NuGraph2 FilterDecoder forward pass.

    # TODO(synk): DecoderBase loss / metrics / confusion-matrix / TensorBoard
    # logging are training-time bookkeeping with no kernel equivalent; only
    # forward() is implemented here.
    """

    def __init__(self, node_features: int, planes, semantic_classes, key,
                 *, tile_nodes: int = 16384):
        self.planes = list(planes)
        self.tile_nodes = tile_nodes
        self.num_features = len(semantic_classes) * node_features
        bound = 1.0 / math.sqrt(self.num_features)   # nn.Linear default init
        self.params = {}
        for p in self.planes:
            key, kw, kb = jax.random.split(key, 3)
            w = jax.random.uniform(kw, (1, self.num_features),
                                   minval=-bound, maxval=bound,
                                   dtype=jnp.float32)
            bias = jax.random.uniform(kb, (1,), minval=-bound, maxval=bound,
                                      dtype=jnp.float32)
            self.params[p] = (w, bias)

    def __call__(self, x: dict, batch=None) -> dict:
        out = {}
        for p in self.planes:
            # torch flatten(start_dim=1) == row-major reshape (bitcast, free)
            xf = x[p].reshape(x[p].shape[0], -1)
            w, bias = self.params[p]
            out[p] = filter_plane_forward(xf, w, bias,
                                          tile_nodes=self.tile_nodes)
        return {"x_filter": out}


if __name__ == "__main__":
    key = jax.random.PRNGKey(0)

    node_features = 8
    semantic_classes = ["MIP", "HIP", "shower", "michel"]   # 4 classes -> D = 32
    planes = ["u", "v", "y"]
    # ragged per-plane node counts: exercise multi-tile grids, partial final
    # blocks (u, v) and an N % 4 != 0 tail (y)
    n_nodes = {"u": 300, "v": 452, "y": 259}

    key, kmodel = jax.random.split(key)
    # small tile_nodes only to exercise the multi-tile / partial-block path at
    # toy sizes; the production default is 16384 nodes (~2 MiB per grid step).
    dec = FilterDecoderPallas(node_features, planes, semantic_classes, kmodel,
                              tile_nodes=128)

    x = {}
    for p in planes:
        key, kx = jax.random.split(key)
        # embedded node features: [N_p, num_semantic_classes, node_features]
        x[p] = jax.random.normal(
            kx, (n_nodes[p], len(semantic_classes), node_features),
            dtype=jnp.float32)

    out = dec(x, batch={})
    out = jax.block_until_ready(out)

    # verify against plain-JAX reference
    ok = True
    for p in planes:
        xf = x[p].reshape(n_nodes[p], -1)
        w, bias = dec.params[p]
        ref = jax.nn.sigmoid(
            jnp.einsum("nd,od->no", xf, w,
                       precision=lax.Precision.HIGHEST) + bias)[:, 0]
        got = out["x_filter"][p]
        ok &= got.shape == (n_nodes[p],)
        ok &= bool(jnp.allclose(got, ref, atol=1e-4, rtol=1e-4))

    if not ok:
        raise SystemExit("FilterDecoder Pallas kernel mismatch vs reference")
    print("KERNEL_OK")
</pallas_src>

<mosaic_0001>
module attributes {stable_mosaic.version = 11 : i64} {
  func.func @_filter_kernel(%arg0: i32, %arg1: memref<32x128xf32, #tpu.memory_space<vmem>>, %arg2: memref<128x4xf32, #tpu.memory_space<vmem>>, %arg3: memref<1x1xf32, #tpu.memory_space<smem>>, %arg4: memref<32x4xf32, #tpu.memory_space<vmem>>) attributes {dimension_semantics = [#tpu.dimension_semantics<parallel>], iteration_bounds = array<i64: 3>, scalar_prefetch = 0 : i64, scratch_operands = 0 : i64, tpu.core_type = #tpu.core_type<tc>, window_params = [{transform_indices = @transform_0, window_bounds = array<i64: 32, 128>}, {pipeline_mode = #tpu.pipeline_mode<synchronous>, transform_indices = @transform_1, window_bounds = array<i64: 128, 4>}, {transform_indices = @transform_2, window_bounds = array<i64: 1, 1>}, {transform_indices = @transform_3, window_bounds = array<i64: 32, 4>}]} {
    %c0 = arith.constant 0 : index
    %c0_0 = arith.constant 0 : index
    %0 = vector.load %arg1[%c0, %c0_0] : memref<32x128xf32, #tpu.memory_space<vmem>>, vector<32x128xf32>
    %c0_1 = arith.constant 0 : index
    %c0_2 = arith.constant 0 : index
    %1 = vector.load %arg2[%c0_1, %c0_2] : memref<128x4xf32, #tpu.memory_space<vmem>>, vector<128x4xf32>
    %cst = arith.constant dense<0.000000e+00> : vector<32x4xf32>
    %2 = tpu.matmul %0, %1, %cst {dimension_numbers = #tpu.dot_dimension_numbers<[1], [0], [0], [1], [0, 0, 1, 1], [], []>} : vector<32x128xf32>, vector<128x4xf32>, vector<32x4xf32> -> vector<32x4xf32>
    %c0_3 = arith.constant 0 : index
    %c0_4 = arith.constant 0 : index
    %3 = memref.load %arg3[%c0_3, %c0_4] : memref<1x1xf32, #tpu.memory_space<smem>>
    %4 = vector.broadcast %3 : f32 to vector<32x4xf32>
    %5 = arith.addf %2, %4 : vector<32x4xf32>
    %cst_5 = arith.constant 0.000000e+00 : f32
    %6 = vector.broadcast %cst_5 : f32 to vector<32x4xf32>
    %7 = arith.cmpf oge, %5, %6 : vector<32x4xf32>
    %cst_6 = arith.constant 0.000000e+00 : f32
    %8 = vector.broadcast %cst_6 : f32 to vector<32x4xf32>
    %9 = arith.subf %8, %5 : vector<32x4xf32>
    %10 = arith.select %7, %9, %5 : vector<32x4xi1>, vector<32x4xf32>
    %11 = math.exp %10 : vector<32x4xf32>
    %cst_7 = arith.constant 1.000000e+00 : f32
    %12 = vector.broadcast %cst_7 : f32 to vector<32x4xf32>
    %13 = arith.addf %12, %11 : vector<32x4xf32>
    %cst_8 = arith.constant 1.000000e+00 : f32
    %14 = vector.broadcast %cst_8 : f32 to vector<32x4xf32>
    %15 = arith.divf %14, %13 : vector<32x4xf32>
    %16 = arith.mulf %11, %15 : vector<32x4xf32>
    %17 = arith.select %7, %15, %16 : vector<32x4xi1>, vector<32x4xf32>
    %c0_9 = arith.constant 0 : index
    %c0_10 = arith.constant 0 : index
    %18 = vector.load %arg4[%c0_9, %c0_10] : memref<32x4xf32, #tpu.memory_space<vmem>>, vector<32x4xf32>
    tpu.vector_store %arg4[%c0_9, %c0_10], %17 {strides = array<i32>} : memref<32x4xf32, #tpu.memory_space<vmem>>, vector<32x4xf32>,
    return
  }
  func.func @transform_0(%arg0: i32) -> (i32, i32) {
    %c0_i32 = arith.constant 0 : i32
    %c0_i32_0 = arith.constant 0 : i32
    return %arg0, %c0_i32 : i32, i32
  }
  func.func @transform_1(%arg0: i32) -> (i32, i32) {
    %c0_i32 = arith.constant 0 : i32
    %c0_i32_0 = arith.constant 0 : i32
    %c0_i32_1 = arith.constant 0 : i32
    return %c0_i32, %c0_i32_0 : i32, i32
  }
  func.func @transform_2(%arg0: i32) -> (i32, i32) {
    %c0_i32 = arith.constant 0 : i32
    %c0_i32_0 = arith.constant 0 : i32
    %c0_i32_1 = arith.constant 0 : i32
    return %c0_i32, %c0_i32_0 : i32, i32
  }
  func.func @transform_3(%arg0: i32) -> (i32, i32) {
    %c0_i32 = arith.constant 0 : i32
    %c0_i32_0 = arith.constant 0 : i32
    return %arg0, %c0_i32 : i32, i32
  }
}

</mosaic_0001>

<bundles_post_ra>
// kernel: tpu_custom_call.1
= control target key start
LH: loop header
LB: loop body
LE: loop exit
PB: predicated region body
PF: predicated region fallthrough
CT: control target
= control target key end

     0   :  { %s1061_s0 = inlined_call_operand.vmem [shape: f32[75,128], index: 0, kind: input, shape index: {}]   ;;  %s1062_s1 = inlined_call_operand.vmem [shape: f32[128,4], index: 1, kind: input, shape index: {}]   ;;  %s1063_s2 = inlined_call_operand.<no memory space> [shape: f32[1,1], index: 2, kind: input, shape index: {}]   ;;  %s1064_s3 = inlined_call_operand.vmem [shape: f32[75,4], index: 3, kind: output, shape index: {}]  }
   0x1   :  { %8 = sst [smem:[#allocation2]] %s1063_s2 }
   0x2   :  { %s905_s14 = smov 0   ;;  %s907_s15 = smov 0  }
   0x3   :  { %s909_s16 = smov 0  }
   0x4 LB: > { %s918_s2 = sadd.s32 4294967295, %s848_s16   ;;  %s920_s17 = sadd.s32 1, %s848_s16   ;;  %s848_s16 = sphi %s909_s16, %s1071_s16   ;;  %s844_s15 = sphi %s907_s15, %s1070_s15   ;;  %s840_s14 = sphi %s905_s14, %s1069_s14  }
   0x5   : > { %s86_s18 = ssub.s32 %s848_s16, %s920_s17  ;;  %s89_s19 = sadd.s32 1, %s844_s15 }
   0x6   : > { %p87_p0 = scmp.eq.s32.totalorder %s86_s18, 0  ;;  %p99_p1 = scmp.ne.s32.totalorder %s844_s15, %s840_s14 }
   0x7   : > { %p100_p2 = scmp.eq.s32.totalorder %s918_s2, 2  ;;  %p576_p3 = scmp.ge.s32.totalorder %s848_s16, 1 }
   0x8   : > { %s928_s20 = scalar_select %p87_p0, %s844_s15, %s89_s19  }
   0x9   : > { %p930_p4 = por %p100_p2, %p99_p1  ;;  %p147_p5 = scmp.lt.s32.totalorder %s848_s16, 4 }
   0xb   : > { %p148_p6 = pnand %p576_p3, %p147_p5 }
   0xc   : > { %s959_s11 = sshll.u32 (!%p148_p6), %s918_s2, 2  ;;  %s213_s12 = sld [smem:[#allocation2]] (!%p148_p6) }
   0xd   : > { %151 = sbr.rel (%p148_p6) target bundleno = 329 (0x149), region = 32  ;;  %p179_p7 = scmp.lt.s32.totalorder (!%p148_p6), %s959_s11, 9 }
   0xe   : > { %s171_s13 = sand.u32 (!%p148_p6), 1, %s840_s14  }
   0xf   : > { %s577_s16 = sshll.u32 (!%p148_p6), %s171_s13, 5 }
  0x10   : > { %s996_s18 = scalar_lea.vmem (!%p148_p6), [#allocation3], %s577_s16  }
  0x12   : > { %v212_v0 = vld [vmem:[%s1062_s1 + $0x78] sm:$0xff]  ;;  %v211_v1 = vld [vmem:[%s1062_s1 + $0x70] sm:$0xff]  ;;  %v210_v2 = vld [vmem:[%s1062_s1 + $0x68] sm:$0xff]  ;;  %s180_s25 = scalar_select %p179_p7, %s959_s11, 9  ;;  %v214_v20 = vstv %s213_s12  ;;  %vm340_vm4 = vcmask 31744  }
  0x13   : > { %620 = vmatprep.subr.mxu0 %v212_v0  ;;  %658 = vmatprep.subr.mxu1 %v212_v0  ;;  %v209_v3 = vld [vmem:[%s1062_s1 + $0x60] sm:$0xff]  ;;  %v208_v4 = vld [vmem:[%s1062_s1 + $0x58] sm:$0xff]  ;;  %v207_v5 = vld [vmem:[%s1062_s1 + $0x50] sm:$0xff]  ;;  %s353_s14 = ssub.s32 (%p930_p4), 10, %s959_s11  ;;  %s597_s19 = sshll.u32 (%p930_p4), %s918_s2, 5 }
  0x14   : > { %621 = vmatpush3.msra.mxu0 %v212_v0  ;;  %674 = vmatpush3.msra.mxu1 %v212_v0  ;;  %v206_v6 = vld [vmem:[%s1062_s1 + $0x48] sm:$0xff]  ;;  %v205_v7 = vld [vmem:[%s1062_s1 + $0x40] sm:$0xff]  ;;  %v204_v8 = vld [vmem:[%s1062_s1 + $0x38] sm:$0xff]  ;;  %s579_s30 = sshll.u32 %s180_s25, 3  ;;  %p354_p8 = scmp.lt.s32.totalorder (%p930_p4), %s353_s14, 4 }
  0x15   : > { %622 = vmatprep.subr.mxu0 %v211_v1  ;;  %659 = vmatprep.subr.mxu1 %v211_v1  ;;  %v203_v9 = vld [vmem:[%s1062_s1 + $0x30] sm:$0xff]  ;;  %v202_v10 = vld [vmem:[%s1062_s1 + $0x28] sm:$0xff]  ;;  %v201_v11 = vld [vmem:[%s1062_s1 + $0x20] sm:$0xff]  ;;  %s182_s8 = scalar_lea.vmem %s1061_s0, %s579_s30  ;;  %s1012_s24 = scalar_lea.vmem (%p930_p4), %s1064_s3, %s597_s19  }
  0x16   : > { %623 = vmatpush3.msra.mxu0 %v211_v1  ;;  %675 = vmatpush3.msra.mxu1 %v211_v1  ;;  %v200_v12 = vld [vmem:[%s1062_s1 + $0x18] sm:$0xff]  ;;  %v199_v13 = vld [vmem:[%s1062_s1 + $0x10] sm:$0xff]  ;;  %v198_v14 = vld [vmem:[%s1062_s1 + $0x8] sm:$0xff] }
  0x17   : > { %624 = vmatprep.subr.mxu0 %v210_v2  ;;  %660 = vmatprep.subr.mxu1 %v210_v2  ;;  %v197_v15 = vld [vmem:[%s1062_s1] sm:$0xff]  ;;  %v195_v17 = vld [vmem:[%s182_s8 + $0x10] sm:$0xff]  ;;  %v194_v18 = vld [vmem:[%s182_s8 + $0x8] sm:$0xff] }
  0x18   : > { %625 = vmatpush3.msra.mxu0 %v210_v2  ;;  %676 = vmatpush3.msra.mxu1 %v210_v2  ;;  %v193_v16 = vld [vmem:[%s182_s8] sm:$0xff]  ;;  %v196_v19 = vld [vmem:[%s182_s8 + $0x18] sm:$0xff] }
  0x19   : > { %626 = vmatprep.subr.mxu0 %v209_v3  ;;  %661 = vmatprep.subr.mxu1 %v209_v3 }
  0x1a   : > { %627 = vmatpush3.msra.mxu0 %v209_v3  ;;  %677 = vmatpush3.msra.mxu1 %v209_v3 }
  0x1b   : > { %628 = vmatprep.subr.mxu0 %v208_v4  ;;  %662 = vmatprep.subr.mxu1 %v208_v4 }
  0x1c   : > { %629 = vmatpush3.msra.mxu0 %v208_v4  ;;  %678 = vmatpush3.msra.mxu1 %v208_v4 }
  0x1d   : > { %630 = vmatprep.subr.mxu0 %v207_v5  ;;  %663 = vmatprep.subr.mxu1 %v207_v5 }
  0x1e   : > { %631 = vmatpush3.msra.mxu0 %v207_v5  ;;  %679 = vmatpush3.msra.mxu1 %v207_v5 }
  0x1f   : > { %632 = vmatprep.subr.mxu0 %v206_v6  ;;  %664 = vmatprep.subr.mxu1 %v206_v6 }
  0x20   : > { %633 = vmatpush3.msra.mxu0 %v206_v6  ;;  %680 = vmatpush3.msra.mxu1 %v206_v6 }
  0x21   : > { %634 = vmatprep.subr.mxu0 %v205_v7  ;;  %665 = vmatprep.subr.mxu1 %v205_v7 }
  0x22   : > { %635 = vmatpush3.msra.mxu0 %v205_v7  ;;  %681 = vmatpush3.msra.mxu1 %v205_v7 }
  0x23   : > { %636 = vmatprep.subr.mxu0 %v204_v8  ;;  %666 = vmatprep.subr.mxu1 %v204_v8 }
  0x24   : > { %637 = vmatpush3.msra.mxu0 %v204_v8  ;;  %682 = vmatpush3.msra.mxu1 %v204_v8 }
  0x25   : > { %638 = vmatprep.subr.mxu0 %v203_v9  ;;  %667 = vmatprep.subr.mxu1 %v203_v9 }
  0x26   : > { %639 = vmatpush3.msra.mxu0 %v203_v9  ;;  %683 = vmatpush3.msra.mxu1 %v203_v9 }
  0x27   : > { %640 = vmatprep.subr.mxu0 %v202_v10  ;;  %668 = vmatprep.subr.mxu1 %v202_v10 }
  0x28   : > { %641 = vmatpush3.msra.mxu0 %v202_v10  ;;  %684 = vmatpush3.msra.mxu1 %v202_v10 }
  0x29   : > { %642 = vmatprep.subr.mxu0 %v201_v11  ;;  %669 = vmatprep.subr.mxu1 %v201_v11 }
  0x2a   : > { %643 = vmatpush3.msra.mxu0 %v201_v11  ;;  %685 = vmatpush3.msra.mxu1 %v201_v11 }
  0x2b   : > { %644 = vmatprep.subr.mxu0 %v200_v12  ;;  %670 = vmatprep.subr.mxu1 %v200_v12 }
  0x2c   : > { %645 = vmatpush3.msra.mxu0 %v200_v12  ;;  %686 = vmatpush3.msra.mxu1 %v200_v12 }
  0x2d   : > { %646 = vmatprep.subr.mxu0 %v199_v13  ;;  %671 = vmatprep.subr.mxu1 %v199_v13 }
  0x2e   : > { %647 = vmatpush3.msra.mxu0 %v199_v13  ;;  %687 = vmatpush3.msra.mxu1 %v199_v13 }
  0x2f   : > { %648 = vmatprep.subr.mxu0 %v198_v14  ;;  %672 = vmatprep.subr.mxu1 %v198_v14 }
  0x30   : > { %649 = vmatpush3.msra.mxu0 %v198_v14  ;;  %688 = vmatpush3.msra.mxu1 %v198_v14 }
  0x31   : > { %650 = vmatprep.subr.mxu0 %v197_v15  ;;  %673 = vmatprep.subr.mxu1 %v197_v15 }
  0x32   : > { %651 = vmatpush3.msra.mxu0 %v197_v15  ;;  %689 = vmatpush3.msra.mxu1 %v197_v15 }
  0x33   : > { %652 = vmatprep.mubr.f32.mxu0 %v193_v16  ;;  %655 = vmatprep.mubr.f32.mxu1 %v195_v17 }
  0x34   : > { %653 = vmatmul.mubr.f32.vlgmr.msra.gmra.mxu0 %v194_v18  ;;  %656 = vmatmul.mubr.f32.vlgmr.msra.gmra.mxu1 %v196_v19 }
  0xf4   : > { %v654_v21 = vpop.f32.mrf.mxu0  ;;  %v657_v22 = vpop.f32.mrf.mxu1 }
  0xf5   : > { %v287_v23 = vadd.f32 %v654_v21, %v214_v20  ;;  %v297_v24 = vadd.f32 %v657_v22, %v214_v20 }
  0xf6   : > { %v281_v25 = vpop.f32.mrf.mxu0  ;;  %v291_v26 = vpop.f32.mrf.mxu1 }
  0xf7   : > { %vm301_vm0 = vcmp.ge.f32.partialorder %v287_v23, 0.0  ;;  %v305_v27 = vsub.f32 0.0, %v287_v23  ;;  %vm303_vm1 = vcmp.ge.f32.partialorder %v297_v24, 0.0  ;;  %v307_v28 = vsub.f32 0.0, %v297_v24 }
  0xf8   : > { %v282_v29 = vadd.f32 %v281_v25, %v214_v20  ;;  %v292_v30 = vadd.f32 %v291_v26, %v214_v20 }
  0xf9   : > { %v309_v31 = vsel %vm301_vm0, %v305_v27, %v287_v23  ;;  %v311_v32 = vsel %vm303_vm1, %v307_v28, %v297_v24 }
  0xfa   : > { %v314_v33 = vmul.f32 1.442695, %v309_v31  ;;  %v318_v34 = vmul.f32 1.442695, %v311_v32  ;;  %vm300_vm2 = vcmp.ge.f32.partialorder %v282_v29, 0.0  ;;  %v304_v35 = vsub.f32 0.0, %v282_v29 }
  0xfb   : > { %vm302_vm3 = vcmp.ge.f32.partialorder %v292_v30, 0.0  ;;  %v306_v36 = vsub.f32 0.0, %v292_v30 }
  0xfc   : > { %778 = vpow2.f32 %v314_v33  ;;  %v308_v37 = vsel %vm300_vm2, %v304_v35, %v282_v29 }
  0xfd   : > { %780 = vpow2.f32 %v318_v34  ;;  %v312_v38 = vmul.f32 1.442695, %v308_v37  ;;  %v310_v39 = vsel %vm302_vm3, %v306_v36, %v292_v30 }
  0xfe   : > { %v316_v40 = vmul.f32 1.442695, %v310_v39 }
  0xff   : > { %782 = vpow2.f32 %v312_v38 }
 0x100   : > { %784 = vpow2.f32 %v316_v40 }
 0x109   : > { %v779_v41 = vpop.eup %778 }
 0x10a   : > { %v781_v42 = vpop.eup %780  ;;  %v321_v43 = vadd.f32 1.0, %v779_v41 }
 0x10b   : > { %v323_v44 = vadd.f32 1.0, %v781_v42 }
 0x10c   : > { %v783_v45 = vpop.eup %782  ;;  %786 = vrcp.f32 %v321_v43 }
 0x10d   : > { %v785_v46 = vpop.eup %784  ;;  %788 = vrcp.f32 %v323_v44  ;;  %v320_v47 = vadd.f32 1.0, %v783_v45 }
 0x10e   : > { %v322_v48 = vadd.f32 1.0, %v785_v46 }
 0x10f   : > { %790 = vrcp.f32 %v320_v47 }
 0x110   : > { %792 = vrcp.f32 %v322_v48 }
 0x119   : > { %v787_v49 = vpop.eup %786 }
 0x11a   : > { %v789_v50 = vpop.eup %788  ;;  %v333_v51 = vmul.f32 %v787_v49, %v779_v41 }
 0x11b   : > { %v335_v52 = vmul.f32 %v789_v50, %v781_v42 }
 0x11c   : > { %v791_v53 = vpop.eup %790  ;;  %v337_v54 = vsel %vm301_vm0, %v787_v49, %v333_v51 }
 0x11d   : > { %v793_v55 = vpop.eup %792  ;;  %342 = vst.msk [vmem:[%s996_s18 + $0x8] sm:$0xff] %vm340_vm4, %v337_v54  ;;  %v339_v56 = vsel %vm303_vm1, %v789_v50, %v335_v52  ;;  %v332_v57 = vmul.f32 %v791_v53, %v783_v45  ;;  %351 = sbr.rel (!%p930_p4) target bundleno = 329 (0x149), region = 36 }
 0x11e   : > { %344 = vst.msk [vmem:[%s996_s18 + $0x18] sm:$0xff] %vm340_vm4, %v339_v56  ;;  %v334_v58 = vmul.f32 %v793_v55, %v785_v46 }
 0x11f   : > { %v336_v59 = vsel %vm300_vm2, %v791_v53, %v332_v57 }
 0x120   : > { %341 = vst.msk [vmem:[%s996_s18] sm:$0xff] %vm340_vm4, %v336_v59  ;;  %v338_v60 = vsel %vm302_vm3, %v793_v55, %v334_v58 }
 0x121   : > { %343 = vst.msk [vmem:[%s996_s18 + $0x10] sm:$0xff] %vm340_vm4, %v338_v60 }
 0x122   : > { %s1073_s14 = smov (!%p354_p8, %s353_s14), 4 }
 0x123   : > { %s582_s25 = sshll.u32 %s1073_s14, 7 }
 0x124   : > { %p585_p9 = scmp.eq.s32.totalorder %s582_s25, 0 }
 0x125   : > { %s1018_s26 = sshrl.u32 (!%p585_p9), %s1073_s14, 2 }
 0x126   : > { %362 = sbr.rel (%p585_p9) target bundleno = 329 (0x149), region = 40  ;;  %p586_p10 = scmp.le.s32.totalorder (!%p585_p9), %s1018_s26, 0 }
 0x12b   : > { %529 = sbr.rel (%p586_p10) target bundleno = 312 (0x138), region = 116  ;;  %s1066_s2 = smov (!%p586_p10), %s1012_s24 }
 0x12c   : > { %s1067_s21 = smov (!%p586_p10), %s996_s18  ;;  %s1027_s11 = smov (!%p586_p10), 0  }
 0x12d   : > { %s862_s27 = smov (!%p586_p10), 0  }
 0x130 LB: >> { %v431_v61 = vld [vmem:[%s856_s21] sm:$0xff]  ;;  %v433_v62 = vld [vmem:[%s856_s21 + $0x8] sm:$0xff]  ;;  %v435_v63 = vld [vmem:[%s856_s21 + $0x10] sm:$0xff]  ;;  %s439_s28 = sadd.s32 1, %s860_s11  ;;  %s425_s27 = sadd.s32 1, %s864_s27   ;;  %s864_s27 = sphi %s862_s27, %s425_s27   ;;  %s860_s11 = sphi %s1027_s11, %s1068_s11   ;;  %s856_s21 = sphi %s1067_s21, %s444_s21   ;;  %s852_s2 = sphi %s1066_s2, %s445_s2  }
 0x131   : >> { %432 = vst [vmem:[%s852_s2] sm:$0xff] %v431_v61  ;;  %434 = vst [vmem:[%s852_s2 + $0x8] sm:$0xff] %v433_v62  ;;  %v437_v0 = vld [vmem:[%s856_s21 + $0x18] sm:$0xff]  ;;  %p440_p11 = scmp.ge.s32.totalorder %s439_s28, %s1018_s26  ;;  %p424_p12 = scmp.ge.s32.totalorder %s425_s27, %s1018_s26 }
 0x132   : >> { %436 = vst [vmem:[%s852_s2 + $0x10] sm:$0xff] %v435_v63  ;;  %438 = vst [vmem:[%s852_s2 + $0x18] sm:$0xff] %v437_v0 }
 0x133   : >> { %s1075_s28 = smov (%p440_p11, %s439_s28), 0  ;;  %427 = sbr.rel (!%p424_p12) target bundleno = 304 (0x130), region = 122 }
 0x134   : >> { %s587_s29 = sshll.u32 %s1075_s28, 5  ;;  %s1068_s11 = smov %s1075_s28 }
 0x135   : >> { %s444_s21 = scalar_lea.vmem %s996_s18, %s587_s29 [#allocation3]   ;;  %s445_s2 = scalar_lea.vmem %s1012_s24, %s587_s29  }
 0x138 PF: > { %s1043_s30 = sand.u32 3, %s1073_s14   ;;  %s598_s4 = sshll.u32 %s1018_s26, 5 }
 0x139   : > { %s450_s5 = scalar_lea.vmem %s996_s18, %s598_s4 [#allocation3]   ;;  %s452_s6 = scalar_lea.vmem %s1012_s24, %s598_s4  }
 0x13a   : > { %p592_p13 = scmp.le.s32.totalorder %s1043_s30, 0 }
 0x13b   : > { %s866_s7 = smov (!%p592_p13), %s452_s6   ;;  %s870_s8 = smov (!%p592_p13), %s450_s5  }
 0x13c   : > { %543 = sbr.rel (%p592_p13) target bundleno = 329 (0x149), region = 127  ;;  %s874_s9 = smov (!%p592_p13), 0  }
 0x13d   : > { %s878_s10 = smov (!%p592_p13), 0  }
 0x141 LB: >> { %v462_v1 = vld [vmem:[%s872_s8] sm:$0xff]  ;;  %s464_s12 = sadd.s32 1, %s876_s9  ;;  %s456_s10 = sadd.s32 1, %s880_s10   ;;  %s880_s10 = sphi %s878_s10, %s456_s10   ;;  %s876_s9 = sphi %s874_s9, %s875_s9   ;;  %s872_s8 = sphi %s870_s8, %s469_s8   ;;  %s868_s7 = sphi %s866_s7, %s470_s7  }
 0x142   : >> { %463 = vst [vmem:[%s868_s7] sm:$0xff] %v462_v1  ;;  %p465_p0 = scmp.ge.s32.totalorder %s464_s12, %s1043_s30  ;;  %p455_p1 = scmp.ge.s32.totalorder %s456_s10, %s1043_s30 }
 0x144   : >> { %s1077_s12 = smov (%p465_p0, %s464_s12), 0  ;;  %458 = sbr.rel (!%p455_p1) target bundleno = 321 (0x141), region = 133 }
 0x145   : >> { %s593_s13 = sshll.u32 %s1077_s12, 3  ;;  %s875_s9 = smov %s1077_s12  }
 0x146   : >> { %s469_s8 = scalar_lea.vmem %s450_s5, %s593_s13 [#allocation3]   ;;  %s470_s7 = scalar_lea.vmem %s452_s6, %s593_s13  }
 0x149 PF: > { %p11_p2 = scmp.ge.s32.totalorder %s920_s17, 5   ;;  %s1069_s14 = smov %s844_s15 }
 0x14a   : > { %s1070_s15 = smov %s928_s20  ;;  %s1071_s16 = smov %s920_s17 }
 0x14b   :  { %13 = sbr.rel (!%p11_p2) target bundleno = 4 (0x4), region = 144 }

</bundles_post_ra>
